<compile_context>
chip_gen: v5e
topology: v5e:2x2
jax: 0.10.0
libtpu: 0.0.40
codegen_flags: <defaults>
</compile_context>

<pallas_src>
import functools

import jax
import jax.numpy as jnp
from jax.experimental import pallas as pl
from jax.experimental.pallas import tpu as pltpu


def _identity_kernel(x_ref, o_ref):
    # Elementwise identity copy of the current VMEM tile.
    o_ref[...] = x_ref[...]


def _choose_lane_width(total):
    """Largest lane width <= 1024 that is a multiple of 128 and divides total."""
    for cand in (1024, 512, 256, 128):
        if total % cand == 0:
            return cand
    return None


def _choose_block_rows(rows, cols, itemsize):
    """Largest row-block that divides `rows`, respects (8,128) tiling and ~4 MiB."""
    if rows % 8 != 0:
        # Full-extent block is always legal (block dim == array dim).
        return rows
    max_block_bytes = 4 * 1024 * 1024
    for cand in (4096, 2048, 1024, 512, 256, 128, 64, 32, 16, 8):
        if cand <= rows and rows % cand == 0 and cand * cols * itemsize <= max_block_bytes:
            return cand
    return rows


def _pallas_identity(x):
    """Identity copy through a lane-dense, tiled, double-buffered Pallas kernel."""
    orig_shape = x.shape
    total = x.size
    itemsize = jnp.dtype(x.dtype).itemsize

    lane = _choose_lane_width(total)
    if lane is None:
        # Fallback for awkward sizes: single full-array block (still correct,
        # just not lane-dense).  Not hit for the shapes this module sees.
        x2d = x.reshape(-1, orig_shape[-1])
        rows, cols = x2d.shape
        block_rows = rows
    else:
        cols = lane
        rows = total // lane
        x2d = x.reshape(rows, cols)
        block_rows = _choose_block_rows(rows, cols, itemsize)

    grid = (rows // block_rows,)
    block_bytes = block_rows * cols * itemsize
    # input + output, each double-buffered, plus headroom.
    vmem_limit = max(4 * block_bytes + (1 << 20), 16 * 1024 * 1024)

    out2d = pl.pallas_call(
        _identity_kernel,
        out_shape=jax.ShapeDtypeStruct((rows, cols), x2d.dtype),
        grid=grid,
        in_specs=[pl.BlockSpec((block_rows, cols), lambda i: (i, 0))],
        out_specs=pl.BlockSpec((block_rows, cols), lambda i: (i, 0)),
        input_output_aliases={0: 0},
        compiler_params=pltpu.CompilerParams(
            dimension_semantics=("parallel",),
            vmem_limit_bytes=vmem_limit,
        ),
    )(x2d)

    return out2d.reshape(orig_shape)


_pallas_identity_jit = jax.jit(_pallas_identity)


def ignore_leaky_relu_forward(x, reverse=False, use_kernel=True):
    """Pallas equivalent of IgnoreLeakyRelu.forward.

    forward: returns (h, logdet) with logdet == 0 (jnp scalar of x.dtype)
    reverse: returns h
    """
    if use_kernel:
        h = _pallas_identity_jit(x)
    else:
        # Optimal path: pure identity, zero HBM traffic.
        h = x
    if reverse:
        return h
    return h, jnp.zeros((), dtype=x.dtype)


if __name__ == "__main__":
    key = jax.random.PRNGKey(0)
    x = jax.random.normal(key, (2, 4, 16, 16), dtype=jnp.float32)

    out, logdet = ignore_leaky_relu_forward(x, reverse=False)
    out = jax.block_until_ready(out)
    logdet = jax.block_until_ready(logdet)

    rev = ignore_leaky_relu_forward(out, reverse=True)
    rev = jax.block_until_ready(rev)

    assert out.shape == x.shape
    assert jnp.allclose(out, x)
    assert jnp.allclose(rev, x)
    assert logdet.shape == ()
    assert logdet.dtype == x.dtype
    assert float(logdet) == 0.0

    print("KERNEL_OK")
</pallas_src>

<mosaic_0001>
module attributes {stable_mosaic.version = 11 : i64} {
  func.func @_identity_kernel(%arg0: i32, %arg1: memref<2x1024xf32, #tpu.memory_space<vmem>>, %arg2: memref<2x1024xf32, #tpu.memory_space<vmem>>) attributes {dimension_semantics = [#tpu.dimension_semantics<parallel>], iteration_bounds = array<i64: 1>, scalar_prefetch = 0 : i64, scratch_operands = 0 : i64, tpu.core_type = #tpu.core_type<tc>, window_params = [{transform_indices = @transform_0, window_bounds = array<i64: 2, 1024>}, {transform_indices = @transform_1, window_bounds = array<i64: 2, 1024>}]} {
    %c0 = arith.constant 0 : index
    %c0_0 = arith.constant 0 : index
    %0 = vector.load %arg1[%c0, %c0_0] : memref<2x1024xf32, #tpu.memory_space<vmem>>, vector<2x1024xf32>
    %c0_1 = arith.constant 0 : index
    %c0_2 = arith.constant 0 : index
    %1 = vector.load %arg2[%c0_1, %c0_2] : memref<2x1024xf32, #tpu.memory_space<vmem>>, vector<2x1024xf32>
    tpu.vector_store %arg2[%c0_1, %c0_2], %0 {strides = array<i32>} : memref<2x1024xf32, #tpu.memory_space<vmem>>, vector<2x1024xf32>,
    return
  }
  func.func @transform_0(%arg0: i32) -> (i32, i32) {
    %c0_i32 = arith.constant 0 : i32
    %c0_i32_0 = arith.constant 0 : i32
    return %arg0, %c0_i32 : i32, i32
  }
  func.func @transform_1(%arg0: i32) -> (i32, i32) {
    %c0_i32 = arith.constant 0 : i32
    %c0_i32_0 = arith.constant 0 : i32
    return %arg0, %c0_i32 : i32, i32
  }
}

</mosaic_0001>

<bundles_post_ra>
// kernel: _pallas_identity.1
= control target key start
LH: loop header
LB: loop body
LE: loop exit
PB: predicated region body
PF: predicated region fallthrough
CT: control target
= control target key end

     0   :  { %s38_s0 = inlined_call_operand.vmem [shape: f32[2,1024], index: 0, kind: input, shape index: {}, may-alias: {0,1}]   ;;  %s39_s1 = inlined_call_operand.vmem [shape: f32[2,1024], index: 1, kind: output, shape index: {}, may-alias: {0,1}]  }
   0x1   :  { %v8_v0 = vld [vmem:[%s38_s0] sm:$0xff]  ;;  %v9_v1 = vld [vmem:[%s38_s0 + $0x8] sm:$0xff] }
   0x2   :  { %10 = vst [vmem:[%s39_s1] sm:$0xff] %v8_v0 }
   0x3   :  { %11 = vst [vmem:[%s39_s1 + $0x8] sm:$0xff] %v9_v1 }

</bundles_post_ra>
